<compile_context>
chip_gen: v6e
topology: v6e:2x2x1
jax: 0.10.0
libtpu: 0.0.40
codegen_flags: <defaults>
</compile_context>

<pallas_src>
import functools

import jax
import jax.numpy as jnp
from jax import lax
from jax.experimental import pallas as pl
from jax.experimental.pallas import tpu as pltpu


# ---------------------------------------------------------------------------
# Pallas kernel: dense bilateral (Gaussian) filtering of the segmentation maps
# ---------------------------------------------------------------------------
def _bilateral_kernel(fi_ref, fj_ref, sj_ref, as_ref, *, chunk):
    # fi_ref: (1, 8, TI)  augmented features of the output-pixel tile   [f, -.5||f||^2, 1, 0]
    # fj_ref: (1, 8, TJ)  augmented features of the contributing tile   [f, 1, -.5||f||^2, 0]
    # sj_ref: (1, Kp, TJ) ROI-masked segmentations (bf16) of the contributing tile
    # as_ref: (1, Kp, TI) filtered output tile (resident f32 accumulator across j)
    j = pl.program_id(2)

    @pl.when(j == 0)
    def _():
        as_ref[...] = jnp.zeros_like(as_ref)

    fi = fi_ref[0]                                   # (8, TI)  f32
    fj = fj_ref[0]                                   # (8, TJ)  f32
    sj = sj_ref[0]                                   # (Kp, TJ) bf16

    tj = fj.shape[1]
    n_chunks = tj // chunk
    acc = jnp.zeros(as_ref.shape[1:], jnp.float32)   # (Kp, TI)

    # Sweep the j tile in chunks: chunk t's exp (EUP) overlaps chunk t±1's matmuls (MXU).
    for c in range(n_chunks):
        lo = c * chunk
        fj_c = fj[:, lo:lo + chunk]                  # (8, chunk)
        sj_c = sj[:, lo:lo + chunk]                  # (Kp, chunk)

        # Augmented-feature trick (f32 for precision; contraction dim is only 8):
        #   arg[tj, ti] = f_i.f_j - 0.5||f_i||^2 - 0.5||f_j||^2 = -0.5||f_i - f_j||^2
        arg = lax.dot_general(fj_c, fi, (((0,), (0,)), ((), ())),
                              preferred_element_type=jnp.float32)    # (chunk, TI)
        w = jnp.exp(arg).astype(jnp.bfloat16)        # Gaussian weights^T (<= 1, bf16-safe)

        # AS tile (Kp, TI) += S_j (Kp, chunk) @ W^T (chunk, TI); f32 accumulation.
        acc = acc + jnp.dot(sj_c, w, preferred_element_type=jnp.float32)

    as_ref[...] += acc[None]


def bilateral_filter_batch(feats_i, feats_j, seg, *, ti, tj, chunk=256):
    """feats_*: (N, 8, Pp) f32, seg: (N, Kp, Pp) bf16  ->  AS: (N, Kp, Pp) f32."""
    N, Fa, Pp = feats_i.shape
    Kp = seg.shape[1]
    assert Pp % ti == 0 and Pp % tj == 0
    chunk = min(chunk, tj)
    assert tj % chunk == 0

    grid = (N, Pp // ti, Pp // tj)
    return pl.pallas_call(
        functools.partial(_bilateral_kernel, chunk=chunk),
        out_shape=jax.ShapeDtypeStruct((N, Kp, Pp), jnp.float32),
        grid_spec=pltpu.PrefetchScalarGridSpec(
            num_scalar_prefetch=0,
            grid=grid,
            in_specs=[
                pl.BlockSpec((1, Fa, ti), lambda n, i, j: (n, 0, i)),  # features (output pixels)
                pl.BlockSpec((1, Fa, tj), lambda n, i, j: (n, 0, j)),  # features (contributors)
                pl.BlockSpec((1, Kp, tj), lambda n, i, j: (n, 0, j)),  # segmentations
            ],
            out_specs=pl.BlockSpec((1, Kp, ti), lambda n, i, j: (n, 0, i)),
        ),
        compiler_params=pltpu.CompilerParams(
            dimension_semantics=("parallel", "parallel", "arbitrary"),
            vmem_limit_bytes=32 * 1024 * 1024,
        ),
    )(feats_i, feats_j, seg)


def _pick_tile(P, N):
    """Largest tile in {128,256,512,1024} with modest padding waste and >=2 parallel steps."""
    p128 = -(-P // 128) * 128
    blk = 128
    for cand in (256, 512, 1024):
        padded = -(-P // cand) * cand
        if padded * 4 <= p128 * 5:           # <= 25% extra padded pixels vs minimal padding
            blk = cand
    while blk > 128 and N * (-(-P // blk)) < 2:
        blk //= 2                            # keep both v7x TensorCores busy
    return blk


# ---------------------------------------------------------------------------
# JAX glue: F.interpolate equivalents (nearest / bilinear, align_corners=False)
# ---------------------------------------------------------------------------
def _resize_nearest(x, scale):
    # x: (..., H, W), PyTorch 'nearest' semantics
    H, W = x.shape[-2], x.shape[-1]
    oh, ow = int(H * scale), int(W * scale)
    ys = jnp.clip(jnp.floor(jnp.arange(oh) * (H / oh)).astype(jnp.int32), 0, H - 1)
    xs = jnp.clip(jnp.floor(jnp.arange(ow) * (W / ow)).astype(jnp.int32), 0, W - 1)
    return x[..., ys, :][..., :, xs]


def _resize_bilinear(x, scale):
    # x: (N, C, H, W), align_corners=False semantics
    N, C, H, W = x.shape
    oh, ow = int(H * scale), int(W * scale)

    def coords(out_sz, in_sz):
        s = in_sz / out_sz
        src = (jnp.arange(out_sz, dtype=jnp.float32) + 0.5) * s - 0.5
        src = jnp.clip(src, 0.0, in_sz - 1.0)
        lo = jnp.floor(src).astype(jnp.int32)
        hi = jnp.minimum(lo + 1, in_sz - 1)
        frac = src - lo.astype(jnp.float32)
        return lo, hi, frac

    y0, y1, wy = coords(oh, H)
    x0, x1, wx = coords(ow, W)
    rows = x[..., y0, :] * (1.0 - wy)[:, None] + x[..., y1, :] * wy[:, None]
    out = rows[..., :, x0] * (1.0 - wx) + rows[..., :, x1] * wx
    return out


# ---------------------------------------------------------------------------
# DenseEnergyLoss forward
# ---------------------------------------------------------------------------
@functools.partial(jax.jit, static_argnames=("weight", "sigma_rgb", "sigma_xy", "scale_factor"))
def dense_energy_loss(images, segmentations, rois, seg_label,
                      *, weight, sigma_rgb, sigma_xy, scale_factor):
    """
    images:        (N, 3, H, W) float32
    segmentations: (N, K, H, W) float32
    rois:          (N, H, W)    float32
    seg_label:     (N, 1, H, W) int32 (255 = unlabeled)
    returns shape (1,) float32, matching torch.tensor([loss]) * weight
    """
    N, K, H, W = segmentations.shape

    # --- scaling, exactly as in the PyTorch module ---
    img_s = _resize_nearest(images, scale_factor)                       # nearest
    seg_s = _resize_bilinear(segmentations, scale_factor)               # bilinear, ac=False
    roi_s = _resize_nearest(rois[:, None], scale_factor)[:, 0]          # nearest
    lbl_s = _resize_nearest(seg_label.astype(jnp.float32), scale_factor)
    unlabel = (lbl_s.astype(jnp.int32) == 255)[:, 0]                    # (N, oh, ow)

    oh, ow = seg_s.shape[-2], seg_s.shape[-1]
    P = oh * ow
    sxy = sigma_xy * scale_factor

    # --- gating (DenseEnergyLossFunction.forward prologue) ---
    seg_max = jnp.max(seg_s, axis=1)                                    # (N, oh, ow)
    gate = roi_s - seg_max
    gate = jnp.where(unlabel, 1.0, gate)
    gate = jnp.maximum(gate, 0.0)                                       # (N, oh, ow)
    seg_masked = seg_s * roi_s[:, None]                                 # (N, K, oh, ow)

    # --- bilateral features, channels-first: (x/sxy, y/sxy, rgb/srgb), p = y*ow + x ---
    yy, xx = jnp.meshgrid(jnp.arange(oh, dtype=jnp.float32),
                          jnp.arange(ow, dtype=jnp.float32), indexing="ij")
    pos = jnp.stack([xx, yy], axis=0).reshape(2, P) / sxy               # (2, P)
    rgb = img_s.reshape(N, 3, P).astype(jnp.float32) / sigma_rgb        # (N, 3, P)
    f = jnp.concatenate([jnp.broadcast_to(pos[None], (N, 2, P)), rgb], axis=1)  # (N, 5, P)

    # Augmented features (Fa padded 5 -> 8 with the norm / one / zero rows), f32,
    # channels-first and lane-dense.  fi . fj = -0.5 ||f_i - f_j||^2 in one matmul.
    half_n = 0.5 * jnp.sum(f * f, axis=1, keepdims=True)                # (N, 1, P)
    ones = jnp.ones((N, 1, P), jnp.float32)
    zero = jnp.zeros((N, 1, P), jnp.float32)
    feats_i = jnp.concatenate([f, -half_n, ones, zero], axis=1)         # (N, 8, P)
    feats_j = jnp.concatenate([f, ones, -half_n, zero], axis=1)         # (N, 8, P)

    seg_flat = seg_masked.reshape(N, K, P).astype(jnp.float32)          # (N, K, P)

    # --- pad pixel axis to a big lane/MXU tile multiple, K to a sublane multiple ---
    blk = _pick_tile(P, N)
    Pp = -(-P // blk) * blk
    Kp = -(-K // 8) * 8
    pad_p = Pp - P
    feats_i_p = jnp.pad(feats_i, ((0, 0), (0, 0), (0, pad_p)))
    feats_j_p = jnp.pad(feats_j, ((0, 0), (0, 0), (0, pad_p)))
    seg_p = jnp.pad(seg_flat, ((0, 0), (0, Kp - K), (0, pad_p))).astype(jnp.bfloat16)

    # --- hot path: dense Gaussian (bilateral) filtering on the MXU/EUP ---
    AS = bilateral_filter_batch(feats_i_p, feats_j_p, seg_p, ti=blk, tj=blk)[:, :K, :P]

    # --- energy: -<seg, Gate * AS> / N, scaled by weight ---
    AS_gated = AS * gate.reshape(N, 1, P)
    loss = -jnp.sum(seg_flat * AS_gated) / N
    return weight * jnp.reshape(loss, (1,))


if __name__ == "__main__":
    key = jax.random.PRNGKey(0)
    k1, k2, k3, k4 = jax.random.split(key, 4)

    N, C, K, H, W = 2, 3, 4, 16, 16
    images = jax.random.uniform(k1, (N, C, H, W), jnp.float32) * 255.0
    logits = jax.random.normal(k2, (N, K, H, W), jnp.float32)
    segmentations = jax.nn.softmax(logits, axis=1)
    rois = (jax.random.uniform(k3, (N, H, W), jnp.float32) > 0.2).astype(jnp.float32)
    raw_lbl = jax.random.randint(k4, (N, 1, H, W), 0, 5)
    seg_label = jnp.where(raw_lbl == 4, 255, raw_lbl).astype(jnp.int32)  # some 255 = unlabeled

    out = dense_energy_loss(
        images, segmentations, rois, seg_label,
        weight=1e-7, sigma_rgb=15.0, sigma_xy=100.0, scale_factor=0.5,
    )
    jax.block_until_ready(out)
    assert out.shape == (1,) and jnp.isfinite(out).all()
    print("KERNEL_OK")
</pallas_src>

<mosaic_0001>
module attributes {stable_mosaic.version = 11 : i64} {
  func.func @_bilateral_kernel(%arg0: i32, %arg1: i32, %arg2: i32, %arg3: memref<1x8x128xf32, #tpu.memory_space<vmem>>, %arg4: memref<1x8x128xf32, #tpu.memory_space<vmem>>, %arg5: memref<1x8x128xbf16, #tpu.memory_space<vmem>>, %arg6: memref<1x8x128xf32, #tpu.memory_space<vmem>>) attributes {dimension_semantics = [#tpu.dimension_semantics<parallel>, #tpu.dimension_semantics<parallel>, #tpu.dimension_semantics<arbitrary>], iteration_bounds = array<i64: 2, 1, 1>, scalar_prefetch = 0 : i64, scratch_operands = 0 : i64, tpu.core_type = #tpu.core_type<tc>, window_params = [{transform_indices = @transform_0, window_bounds = array<i64: 1, 8, 128>}, {transform_indices = @transform_1, window_bounds = array<i64: 1, 8, 128>}, {transform_indices = @transform_2, window_bounds = array<i64: 1, 8, 128>}, {transform_indices = @transform_3, window_bounds = array<i64: 1, 8, 128>}]} {
    %c0_i32 = arith.constant 0 : i32
    %0 = arith.cmpi eq, %arg2, %c0_i32 : i32
    %1 = arith.extui %0 : i1 to i32
    %c0_i32_0 = arith.constant 0 : i32
    %2 = arith.cmpi ne, %1, %c0_i32_0 : i32
    scf.if %2 {
      %cst_17 = arith.constant 0.000000e+00 : f32
      %19 = vector.broadcast %cst_17 : f32 to vector<1x8x128xf32>
      %c0_18 = arith.constant 0 : index
      %c0_19 = arith.constant 0 : index
      %c0_20 = arith.constant 0 : index
      %20 = vector.load %arg6[%c0_18, %c0_19, %c0_20] : memref<1x8x128xf32, #tpu.memory_space<vmem>>, vector<1x8x128xf32>
      tpu.vector_store %arg6[%c0_18, %c0_19, %c0_20], %19 {strides = array<i32>} : memref<1x8x128xf32, #tpu.memory_space<vmem>>, vector<1x8x128xf32>,
    } else {
    }
    %c0 = arith.constant 0 : index
    %c0_1 = arith.constant 0 : index
    %c0_2 = arith.constant 0 : index
    %3 = vector.load %arg3[%c0, %c0_1, %c0_2] : memref<1x8x128xf32, #tpu.memory_space<vmem>>, vector<1x8x128xf32>
    %4 = vector.shape_cast %3 : vector<1x8x128xf32> to vector<8x128xf32>
    %c0_3 = arith.constant 0 : index
    %c0_4 = arith.constant 0 : index
    %c0_5 = arith.constant 0 : index
    %5 = vector.load %arg4[%c0_3, %c0_4, %c0_5] : memref<1x8x128xf32, #tpu.memory_space<vmem>>, vector<1x8x128xf32>
    %6 = vector.shape_cast %5 : vector<1x8x128xf32> to vector<8x128xf32>
    %c0_6 = arith.constant 0 : index
    %c0_7 = arith.constant 0 : index
    %c0_8 = arith.constant 0 : index
    %7 = vector.load %arg5[%c0_6, %c0_7, %c0_8] : memref<1x8x128xbf16, #tpu.memory_space<vmem>>, vector<1x8x128xbf16>
    %8 = vector.shape_cast %7 : vector<1x8x128xbf16> to vector<8x128xbf16>
    %cst = arith.constant 0.000000e+00 : f32
    %9 = vector.broadcast %cst : f32 to vector<8x128xf32>
    %cst_9 = arith.constant dense<0.000000e+00> : vector<128x128xf32>
    %10 = tpu.matmul %6, %4, %cst_9 {dimension_numbers = #tpu.dot_dimension_numbers<[0], [0], [1], [1], [0, 1, 1, 1], [], []>} : vector<8x128xf32>, vector<8x128xf32>, vector<128x128xf32> -> vector<128x128xf32>
    %11 = math.exp %10 : vector<128x128xf32>
    %12 = arith.truncf %11 : vector<128x128xf32> to vector<128x128xbf16>
    %cst_10 = arith.constant dense<0.000000e+00> : vector<8x128xf32>
    %13 = tpu.matmul %8, %12, %cst_10 {dimension_numbers = #tpu.dot_dimension_numbers<[1], [0], [0], [1], [0, 0, 1, 1], [], []>} : vector<8x128xbf16>, vector<128x128xbf16>, vector<8x128xf32> -> vector<8x128xf32>
    %14 = arith.addf %9, %13 : vector<8x128xf32>
    %c0_11 = arith.constant 0 : index
    %c0_12 = arith.constant 0 : index
    %c0_13 = arith.constant 0 : index
    %15 = vector.load %arg6[%c0_11, %c0_12, %c0_13] : memref<1x8x128xf32, #tpu.memory_space<vmem>>, vector<1x8x128xf32>
    %16 = vector.shape_cast %14 : vector<8x128xf32> to vector<1x8x128xf32>
    %17 = arith.addf %15, %16 : vector<1x8x128xf32>
    %c0_14 = arith.constant 0 : index
    %c0_15 = arith.constant 0 : index
    %c0_16 = arith.constant 0 : index
    %18 = vector.load %arg6[%c0_14, %c0_15, %c0_16] : memref<1x8x128xf32, #tpu.memory_space<vmem>>, vector<1x8x128xf32>
    tpu.vector_store %arg6[%c0_14, %c0_15, %c0_16], %17 {strides = array<i32>} : memref<1x8x128xf32, #tpu.memory_space<vmem>>, vector<1x8x128xf32>,
    return
  }
  func.func @transform_0(%arg0: i32, %arg1: i32, %arg2: i32) -> (i32, i32, i32) {
    %c0_i32 = arith.constant 0 : i32
    %c0_i32_0 = arith.constant 0 : i32
    return %arg0, %c0_i32, %arg1 : i32, i32, i32
  }
  func.func @transform_1(%arg0: i32, %arg1: i32, %arg2: i32) -> (i32, i32, i32) {
    %c0_i32 = arith.constant 0 : i32
    %c0_i32_0 = arith.constant 0 : i32
    return %arg0, %c0_i32, %arg2 : i32, i32, i32
  }
  func.func @transform_2(%arg0: i32, %arg1: i32, %arg2: i32) -> (i32, i32, i32) {
    %c0_i32 = arith.constant 0 : i32
    %c0_i32_0 = arith.constant 0 : i32
    return %arg0, %c0_i32, %arg2 : i32, i32, i32
  }
  func.func @transform_3(%arg0: i32, %arg1: i32, %arg2: i32) -> (i32, i32, i32) {
    %c0_i32 = arith.constant 0 : i32
    %c0_i32_0 = arith.constant 0 : i32
    return %arg0, %c0_i32, %arg1 : i32, i32, i32
  }
}

</mosaic_0001>

<bundles_post_ra>
// kernel: dense_energy_loss.1
= control target key start
LH: loop header
LB: loop body
LE: loop exit
PB: predicated region body
PF: predicated region fallthrough
CT: control target
= control target key end

     0   :  { %s888_s12 = smov 0   ;;  %s890_s13 = smov 0   ;;  %s961_s0 = inlined_call_operand.vmem [shape: f32[2,8,128], index: 0, kind: input, shape index: {}]   ;;  %s962_s1 = inlined_call_operand.vmem [shape: f32[2,8,128], index: 1, kind: input, shape index: {}]   ;;  %s963_s2 = inlined_call_operand.vmem [shape: bf16[2,8,128], index: 2, kind: input, shape index: {}]   ;;  %s964_s3 = inlined_call_operand.vmem [shape: f32[2,8,128], index: 3, kind: output, shape index: {}]  }
   0x1   :  { %s892_s14 = smov 0  }
   0x2 LB: > { %s32_s15 = sadd.s32 1, %s860_s13  ;;  %p689_p0 = scmp.ge.s32.totalorder %s864_s14, 1  ;;  %s864_s14 = sphi %s892_s14, %s13_s14   ;;  %s860_s13 = sphi %s890_s13, %s966_s13   ;;  %s856_s12 = sphi %s888_s12, %s965_s12  }
   0x3   : > { %p34_p1 = scmp.ge.s32.totalorder %s32_s15, 2  ;;  %p190_p2 = scmp.lt.s32.totalorder %s864_s14, 3 }
   0x5   : > { %s968_s15 = smov (%p34_p1, %s32_s15), 0  ;;  %p191_p3 = pnand %p689_p0, %p190_p2 }
   0x6   : > { %p232_p4 = scmp.lt.s32.totalorder (!%p191_p3), %s856_s12, 1 }
   0x7   : > { %194 = sbr.rel (%p191_p3) target bundleno = 644 (0x284), region = 32 }
   0xc   : > { %s970_s12 = smov (!%p232_p4, %s856_s12), 1  ;;  %vm301_vm0 = vcmask 64512   ;;  %v866_v18 = vmov 0.0   ;;  %vm867_vm1 = vmmov 0  }
   0xd   : > { %s909_s16 = sshll.u32 %s970_s12, 3  ;;  %764 = vmatprep.subr.bf16.mxu1 %v866_v18  ;;  %780 = vmatprep.mubr.msk.bf16.mxu1 %vm867_vm1, %v866_v18  ;;  %s692_s23 = sshll.u32 %s970_s12, 2 }
   0xe   : > { %s245_s19 = scalar_lea.vmem %s962_s1, %s909_s16  ;;  %s238_s22 = scalar_lea.vmem %s961_s0, %s909_s16 }
   0xf   : > { %v267_v0 = vld [vmem:[%s245_s19] sm:$0xff]  ;;  %s252_s26 = scalar_lea.vmem %s963_s2, %s692_s23  ;;  %s259_s29 = scalar_lea.vmem %s964_s3, %s909_s16 }
  0x10   : > { %v266_v1 = vld [vmem:[%s238_s22] sm:$0xff]  ;;  %269 = vxpose.xlu0.b32.start.end [1/1] (short) %v267_v0, 128 }
  0x11   : > { %738 = vmatprep.subr.mxu0 %v266_v1 }
  0x12   : > { %739 = vmatpush3.msra.mxu0 %v266_v1 }
  0x8c   : > { %v285_v2 = vpop.trf.xlu0 }
  0x8d   : > { %740 = vmatprep.mubr.msk.f32.mxu0 %vm301_vm0, %v285_v2 }
  0x90   : > { %v286_v3 = vpop.trf.xlu0 }
  0x91   : > { %741 = vmatmul.mubr.msk.f32.vlgmr.msra.gmra.mxu0 %vm301_vm0, %v286_v3 }
  0x94   : > { %v287_v4 = vpop.trf.xlu0 }
  0x95   : > { %743 = vmatprep.mubr.msk.f32.mxu0 %vm301_vm0, %v287_v4 }
  0x98   : > { %v288_v5 = vpop.trf.xlu0 }
  0x99   : > { %744 = vmatmul.mubr.msk.f32.gmra.mxu0 %vm301_vm0, %v288_v5 }
  0x9c   : > { %v289_v6 = vpop.trf.xlu0 }
  0x9d   : > { %746 = vmatprep.mubr.msk.f32.mxu0 %vm301_vm0, %v289_v6 }
  0xa0   : > { %v290_v7 = vpop.trf.xlu0 }
  0xa1   : > { %747 = vmatmul.mubr.msk.f32.gmra.mxu0 %vm301_vm0, %v290_v7 }
  0xa4   : > { %v291_v8 = vpop.trf.xlu0 }
  0xa5   : > { %749 = vmatprep.mubr.msk.f32.mxu0 %vm301_vm0, %v291_v8 }
  0xa8   : > { %v292_v9 = vpop.trf.xlu0 }
  0xa9   : > { %750 = vmatmul.mubr.msk.f32.gmra.mxu0 %vm301_vm0, %v292_v9 }
  0xac   : > { %v293_v10 = vpop.trf.xlu0 }
  0xad   : > { %752 = vmatprep.mubr.msk.f32.mxu0 %vm301_vm0, %v293_v10 }
  0xb0   : > { %v294_v11 = vpop.trf.xlu0 }
  0xb1   : > { %753 = vmatmul.mubr.msk.f32.gmra.mxu0 %vm301_vm0, %v294_v11  ;;  %v268_v11 = vld [vmem:[%s252_s26] sm:$0xf] }
  0xb4   : > { %v295_v12 = vpop.trf.xlu0 }
  0xb5   : > { %755 = vmatprep.mubr.msk.f32.mxu0 %vm301_vm0, %v295_v12 }
  0xb8   : > { %v296_v13 = vpop.trf.xlu0 }
  0xb9   : > { %756 = vmatmul.mubr.msk.f32.gmra.mxu0 %vm301_vm0, %v296_v13 }
  0xbc   : > { %v297_v14 = vpop.trf.xlu0 }
  0xbd   : > { %758 = vmatprep.mubr.msk.f32.mxu0 %vm301_vm0, %v297_v14 }
  0xc0   : > { %v298_v15 = vpop.trf.xlu0 }
  0xc1   : > { %759 = vmatmul.mubr.msk.f32.gmra.mxu0 %vm301_vm0, %v298_v15 }
  0xc4   : > { %v299_v16 = vpop.trf.xlu0 }
  0xc5   : > { %761 = vmatprep.mubr.msk.f32.mxu0 %vm301_vm0, %v299_v16 }
  0xc8   : > { %v300_v17 = vpop.trf.xlu0 }
  0xc9   : > { %762 = vmatmul.mubr.msk.f32.gmra.mxu0 %vm301_vm0, %v300_v17 }
 0x151   : > { %v742_v19 = vpop.f32.mrf.mxu0 }
 0x152   : > { %v497_v60 = vmul.f32 1.442695, %v742_v19 }
 0x153   : > { %v416_v20 = vpop.f32.mrf.mxu0 }
 0x154   : > { %v495_v57 = vmul.f32 1.442695, %v416_v20 }
 0x159   : > { %v745_v21 = vpop.f32.mrf.mxu0 }
 0x15a   : > { %v501_v55 = vmul.f32 1.442695, %v745_v21 }
 0x15b   : > { %v426_v22 = vpop.f32.mrf.mxu0 }
 0x15c   : > { %v499_v52 = vmul.f32 1.442695, %v426_v22 }
 0x161   : > { %v748_v23 = vpop.f32.mrf.mxu0 }
 0x162   : > { %v505_v50 = vmul.f32 1.442695, %v748_v23 }
 0x163   : > { %v436_v24 = vpop.f32.mrf.mxu0 }
 0x164   : > { %v503_v47 = vmul.f32 1.442695, %v436_v24 }
 0x169   : > { %v751_v25 = vpop.f32.mrf.mxu0 }
 0x16a   : > { %v509_v45 = vmul.f32 1.442695, %v751_v25 }
 0x16b   : > { %v446_v26 = vpop.f32.mrf.mxu0 }
 0x16c   : > { %v507_v43 = vmul.f32 1.442695, %v446_v26 }
 0x171   : > { %v754_v27 = vpop.f32.mrf.mxu0 }
 0x172   : > { %v513_v42 = vmul.f32 1.442695, %v754_v27 }
 0x173   : > { %v456_v28 = vpop.f32.mrf.mxu0 }
 0x174   : > { %v511_v41 = vmul.f32 1.442695, %v456_v28 }
 0x179   : > { %v757_v29 = vpop.f32.mrf.mxu0 }
 0x17a   : > { %v517_v40 = vmul.f32 1.442695, %v757_v29 }
 0x17b   : > { %v466_v30 = vpop.f32.mrf.mxu0 }
 0x17c   : > { %v515_v39 = vmul.f32 1.442695, %v466_v30 }
 0x181   : > { %v760_v31 = vpop.f32.mrf.mxu0 }
 0x182   : > { %v521_v38 = vmul.f32 1.442695, %v760_v31 }
 0x183   : > { %v476_v32 = vpop.f32.mrf.mxu0 }
 0x184   : > { %v519_v36 = vmul.f32 1.442695, %v476_v32 }
 0x189   : > { %v763_v33 = vpop.f32.mrf.mxu0 }
 0x18a   : > { %v525_v34 = vmul.f32 1.442695, %v763_v33 }
 0x18b   : > { %v486_v35 = vpop.f32.mrf.mxu0 }
 0x18c   : > { %v523_v37 = vmul.f32 1.442695, %v486_v35  ;;  %810 = vpow2.f32 %v525_v34 }
 0x18e   : > { %812 = vpow2.f32 %v523_v37 }
 0x18f   : > { %814 = vpow2.f32 %v519_v36 }
 0x190   : > { %816 = vpow2.f32 %v521_v38 }
 0x191   : > { %818 = vpow2.f32 %v515_v39 }
 0x192   : > { %820 = vpow2.f32 %v517_v40 }
 0x193   : > { %822 = vpow2.f32 %v511_v41 }
 0x194   : > { %824 = vpow2.f32 %v513_v42 }
 0x195   : > { %826 = vpow2.f32 %v507_v43 }
 0x196   : > { %828 = vpow2.f32 %v509_v45 }
 0x197   : > { %830 = vpow2.f32 %v503_v47 }
 0x198   : > { %832 = vpow2.f32 %v505_v50 }
 0x199   : > { %v811_v44 = vpop.eup %810  ;;  %834 = vpow2.f32 %v499_v52 }
 0x19a   : > { %836 = vpow2.f32 %v501_v55 }
 0x19b   : > { %v813_v46 = vpop.eup %812  ;;  %838 = vpow2.f32 %v495_v57 }
 0x19c   : > { %v534_v48 = vpack.c.bf16 %v811_v44, %v813_v46  ;;  %v815_v49 = vpop.eup %814  ;;  %840 = vpow2.f32 %v497_v60 }
 0x19d   : > { %v817_v51 = vpop.eup %816 }
 0x19e   : > { %765 = vmatpush3.bf16.msra.mxu1 %v534_v48  ;;  %v533_v53 = vpack.c.bf16 %v817_v51, %v815_v49  ;;  %v819_v54 = vpop.eup %818 }
 0x19f   : > { %766 = vmatprep.subr.bf16.mxu1 %v866_v18  ;;  %v821_v56 = vpop.eup %820 }
 0x1a0   : > { %v532_v58 = vpack.c.bf16 %v821_v56, %v819_v54  ;;  %v823_v59 = vpop.eup %822 }
 0x1a1   : > { %v825_v61 = vpop.eup %824 }
 0x1a2   : > { %767 = vmatpush3.bf16.msra.mxu1 %v533_v53  ;;  %v531_v62 = vpack.c.bf16 %v825_v61, %v823_v59  ;;  %v827_v63 = vpop.eup %826 }
 0x1a3   : > { %768 = vmatprep.subr.bf16.mxu1 %v866_v18  ;;  %v829_v0 = vpop.eup %828 }
 0x1a4   : > { %v530_v1 = vpack.c.bf16 %v829_v0, %v827_v63  ;;  %v831_v2 = vpop.eup %830 }
 0x1a5   : > { %v833_v3 = vpop.eup %832 }
 0x1a6   : > { %769 = vmatpush3.bf16.msra.mxu1 %v532_v58  ;;  %v529_v4 = vpack.c.bf16 %v833_v3, %v831_v2  ;;  %v835_v5 = vpop.eup %834 }
 0x1a7   : > { %770 = vmatprep.subr.bf16.mxu1 %v866_v18  ;;  %v837_v6 = vpop.eup %836 }
 0x1a8   : > { %v528_v7 = vpack.c.bf16 %v837_v6, %v835_v5  ;;  %v839_v8 = vpop.eup %838 }
 0x1a9   : > { %v841_v9 = vpop.eup %840 }
 0x1aa   : > { %771 = vmatpush3.bf16.msra.mxu1 %v531_v62  ;;  %v527_v10 = vpack.c.bf16 %v841_v9, %v839_v8 }
 0x1ab   : > { %772 = vmatprep.subr.bf16.mxu1 %v866_v18 }
 0x1ae   : > { %773 = vmatpush3.bf16.msra.mxu1 %v530_v1 }
 0x1af   : > { %774 = vmatprep.subr.bf16.mxu1 %v866_v18 }
 0x1b2   : > { %775 = vmatpush3.bf16.msra.mxu1 %v529_v4 }
 0x1b3   : > { %776 = vmatprep.subr.bf16.mxu1 %v866_v18 }
 0x1b6   : > { %777 = vmatpush3.bf16.msra.mxu1 %v528_v7 }
 0x1b7   : > { %778 = vmatprep.subr.bf16.mxu1 %v866_v18 }
 0x1ba   : > { %779 = vmatpush3.bf16.msra.mxu1 %v527_v10 }
 0x1bd   : > { %781 = vmatmul.mubr.bf16.vlgmr.msra.gmra.mxu1 %v268_v11 }
 0x27d   : > { %v569_v12 = vpop.f32.mrf.mxu1 }
 0x27e   : > { %577 = vst [vmem:[%s259_s29] sm:$0xff] %v569_v12 }
 0x27f   : > { %v782_v13 = vpop.f32.mrf.mxu1 }
 0x281   : > { %v572_v14 = vpop.f32.mrf.mxu1 }
 0x283   : > { %v783_v15 = vpop.f32.mrf.mxu1 }
 0x284 PF: > { %s13_s14 = sadd.s32 1, %s864_s14   ;;  %s965_s12 = smov %s860_s13 }
 0x285   : > { %p10_p5 = scmp.ge.s32.totalorder %s13_s14, 4   ;;  %s966_s13 = smov %s968_s15 }
 0x287   :  { %12 = sbr.rel (!%p10_p5) target bundleno = 2 (0x2), region = 72 }

</bundles_post_ra>
